<compile_context>
chip_gen: v6e
topology: v6e:2x2x1
jax: 0.10.0
libtpu: 0.0.40
codegen_flags: <defaults>
</compile_context>

<pallas_src>
import functools

import numpy as np
import jax
import jax.numpy as jnp
from jax import lax
from jax.experimental import pallas as pl
from jax.experimental.pallas import tpu as pltpu


@functools.lru_cache(maxsize=None)
def _cheb_projection(seq_len: int, degree: int, ncols: int) -> np.ndarray:
    """P = pinv(A).T zero-padded to [seq_len, ncols] (lane-dense).

    A[i, k] = T_k(t_i), t_i on [-1, 1]. Computed once per (seq, degree) on the
    host; an on-device pinv/SVD would dominate wall clock.
    """
    t = np.linspace(-1.0, 1.0, seq_len, dtype=np.float64)
    cols = [np.ones_like(t), t]
    for _ in range(2, degree + 1):
        cols.append(2.0 * t * cols[-1] - cols[-2])
    A = np.stack(cols[: degree + 1], axis=-1)            # [seq, degree+1]
    P = np.linalg.pinv(A).T                               # [seq, degree+1]
    P_pad = np.zeros((seq_len, ncols), dtype=np.float32)
    P_pad[:, : degree + 1] = P.astype(np.float32)
    return P_pad


def _cheb_loss_kernel(B, tb, n_inner,
                      pred_ref, targ_ref, proj_ref, out_ref, acc_ref):
    c = pl.program_id(0)                                  # partial-sum row ("parallel")
    i = pl.program_id(1)                                  # batch tile within core ("arbitrary")

    @pl.when(i == 0)
    def _():
        acc_ref[...] = jnp.zeros_like(acc_ref)

    # Mask rows past the true batch: the tail tile may contain garbage rows, and
    # fully out-of-range logical tiles (clamped in the index_map) mask to zero.
    tile_idx = c * n_inner + i
    remaining = B - tile_idx * tb
    row = lax.broadcasted_iota(jnp.int32, (tb, 1), 0)
    valid = row < remaining

    # Fused: |p@P - t@P| == |(p - t)@P| (projection is linear). bf16 inputs are
    # upcast in-register; diff/matmul/accumulation stay f32.
    p = pred_ref[...].astype(jnp.float32)
    q = targ_ref[...].astype(jnp.float32)
    diff = jnp.where(valid, p - q, 0.0)                   # VPU (select -> no NaN leak)

    coef = jnp.dot(diff, proj_ref[...],                   # single MXU pass, [tb, ncols]
                   preferred_element_type=jnp.float32)

    # Lane-resident partial sums: fold sublane groups of 8 with pure VPU adds.
    # No per-step cross-lane reduce, no scalar read-modify-write chain.
    a = jnp.abs(coef)
    acc_ref[...] += a.reshape(tb // 8, 8, a.shape[-1]).sum(axis=0)

    @pl.when(i == n_inner - 1)
    def _():
        out_ref[...] = acc_ref[...]                       # per-core partial sums


def chebyshev_loss(predictions: jnp.ndarray, targets: jnp.ndarray,
                   degree: int = 4, batch_tile: int | None = None) -> jnp.ndarray:
    assert predictions.shape == targets.shape and predictions.ndim == 2
    B, S = predictions.shape
    n_coef = degree + 1
    ncols = max(128, ((n_coef + 127) // 128) * 128)       # lane-dense projection

    # bf16 inputs are fed straight through (halves HBM reads); anything else -> f32.
    in_dtype = predictions.dtype
    if in_dtype not in (jnp.dtype(jnp.bfloat16), jnp.dtype(jnp.float32)):
        in_dtype = jnp.dtype(jnp.float32)
    pred = predictions.astype(in_dtype)
    targ = targets.astype(in_dtype)
    proj = jnp.asarray(_cheb_projection(S, degree, ncols), dtype=jnp.float32)

    # Only pathological tiny batches (< 8 rows) get padded up to the sublane
    # minimum; the general path never re-reads/re-writes the [B,S] inputs in HBM.
    B_rows = B
    if B_rows < 8:
        extra = 8 - B_rows
        pred = jnp.pad(pred, ((0, extra), (0, 0)))
        targ = jnp.pad(targ, ((0, extra), (0, 0)))
        B_rows = 8

    itemsize = jnp.dtype(in_dtype).itemsize
    row_in_bytes = S * itemsize

    # --- generation-aware tile / VMEM budget -------------------------------
    try:
        vmem_cap = int(pltpu.get_tpu_info().vmem_capacity_bytes)
    except Exception:
        vmem_cap = 64 << 20                               # v7x worst case
    usable = min(int(0.55 * vmem_cap), 48 << 20)          # ~35 MiB v7x, 48 MiB v5e/v6e
    per_row = S * (4 * itemsize + 4)                      # 2 inputs x 2 bufs + f32 diff temp
    proj_bytes = 2 * S * ncols * 4                        # budgeted double-buffered (worst case)
    tb_cap = max(8, ((usable - proj_bytes - (2 << 20)) // per_row) // 8 * 8)

    b8 = (B_rows // 8) * 8                                # largest mult-of-8 tile <= B_rows
    if batch_tile is None:
        # Aim for ~4 tiles (2 per TensorCore on v7x) while keeping each input
        # tile >= ~1 MiB when the batch allows (DMA efficiency).
        min_rows_1mb = max(8, ((((1 << 20) // max(row_in_bytes, 1)) + 7) // 8) * 8)
        quarter = max(8, ((b8 // 4) // 8) * 8) if b8 >= 32 else b8
        tb = min(2048, tb_cap, b8, max(quarter, min_rows_1mb))
    else:
        tb = batch_tile
    tb = max(8, min((tb // 8) * 8, b8))

    n_tiles = pl.cdiv(B, tb)                              # logical tiles; tail masked in-kernel
    n_cores = 2 if n_tiles > 1 else 1                     # leading "parallel" axis (v7x 2 TCs)
    n_inner = pl.cdiv(n_tiles, n_cores)
    grid = (n_cores, n_inner)

    def in_map(c, i):
        # Clamp so any out-of-range logical tile of the ragged core split re-reads
        # the last valid tile; its rows are zero-masked in-kernel.
        return (jnp.minimum(c * n_inner + i, n_tiles - 1), 0)

    vmem_need = (4 * tb * row_in_bytes                    # 2 inputs x 2 pipeline buffers
                 + tb * S * 4                             # f32 diff temporary
                 + proj_bytes                             # projection
                 + 2 * tb * ncols * 4                     # coef / |coef| temporaries
                 + (2 << 20))                             # headroom
    vmem_limit = int(min(max(vmem_need, 8 << 20), int(0.8 * vmem_cap)))

    kernel = functools.partial(_cheb_loss_kernel, B, tb, n_inner)
    out_shape = jax.ShapeDtypeStruct((n_cores * 8, ncols), jnp.float32)
    cost = pl.CostEstimate(
        flops=int(2 * n_tiles * tb * S * ncols + n_tiles * tb * S),
        transcendentals=0,
        bytes_accessed=int(2 * B * S * itemsize + S * ncols * 4
                           + n_cores * 8 * ncols * 4),
    )
    cparams = pltpu.CompilerParams(
        dimension_semantics=("parallel", "arbitrary"),
        vmem_limit_bytes=vmem_limit,
    )

    def build(proj_spec):
        return pl.pallas_call(
            kernel,
            out_shape=out_shape,
            grid_spec=pltpu.PrefetchScalarGridSpec(
                num_scalar_prefetch=0,
                grid=grid,
                in_specs=[
                    pl.BlockSpec((tb, S), in_map),                 # pred tile
                    pl.BlockSpec((tb, S), in_map),                 # targ tile
                    proj_spec,                                     # projection (constant block)
                ],
                out_specs=pl.BlockSpec((8, ncols), lambda c, i: (c, 0)),
                scratch_shapes=[pltpu.VMEM((8, ncols), jnp.float32)],
            ),
            compiler_params=cparams,
            cost_estimate=cost,
        )

    try:
        # Constant block index -> single-buffer the projection (saves one
        # S*ncols*4 VMEM copy; matters most on v7x's 64 MiB VMEM).
        proj_spec = pl.BlockSpec((S, ncols), lambda c, i: (0, 0),
                                 pipeline_mode=pl.Buffered(1))
        partial_sums = build(proj_spec)(pred, targ, proj)
    except Exception:
        # Fallback for JAX builds without BlockSpec.pipeline_mode support.
        proj_spec = pl.BlockSpec((S, ncols), lambda c, i: (0, 0))
        partial_sums = build(proj_spec)(pred, targ, proj)

    # Single tiny cross-lane reduce + mean over the TRUE B*(degree+1), outside the
    # hot loop (padded lanes / masked rows contributed exactly zero).
    return jnp.sum(partial_sums) / jnp.float32(B * n_coef)


if __name__ == "__main__":
    # args.degree = 4 ; small shapes: batch=20 (not a multiple of the tile), seq=128
    degree = 4
    batch, seq = 20, 128

    key = jax.random.PRNGKey(0)
    k_pred, k_targ = jax.random.split(key)
    predictions = jax.random.normal(k_pred, (batch, seq), dtype=jnp.float32)
    targets = jax.random.normal(k_targ, (batch, seq), dtype=jnp.float32)

    # pure-JAX reference (unfused form, identical to the torch module's semantics)
    P = jnp.asarray(_cheb_projection(seq, degree, 128)[:, : degree + 1])
    ref = jnp.mean(jnp.abs(predictions @ P - targets @ P))

    # Explicit small tile: exercises tail-row masking, the clamped fully-masked
    # ragged tile on core 1, and multi-tile accumulation. grid = (2, 2).
    loss = jax.block_until_ready(
        chebyshev_loss(predictions, targets, degree, batch_tile=8))
    assert jnp.allclose(loss, ref, rtol=1e-4, atol=1e-5), (loss, ref)

    # Default (auto) tiling path. grid = (2, 1).
    loss2 = jax.block_until_ready(chebyshev_loss(predictions, targets, degree))
    assert jnp.allclose(loss2, ref, rtol=1e-4, atol=1e-5), (loss2, ref)

    # bf16 fast path (reference recomputed from the bf16-rounded inputs).
    p_b = predictions.astype(jnp.bfloat16)
    t_b = targets.astype(jnp.bfloat16)
    ref_b = jnp.mean(jnp.abs(
        (p_b.astype(jnp.float32) - t_b.astype(jnp.float32)) @ P))
    loss_b = jax.block_until_ready(
        chebyshev_loss(p_b, t_b, degree, batch_tile=8))
    assert jnp.allclose(loss_b, ref_b, rtol=1e-3, atol=1e-4), (loss_b, ref_b)

    print("KERNEL_OK")
</pallas_src>

<mosaic_0001>
module attributes {stable_mosaic.version = 11 : i64} {
  func.func @_cheb_loss_kernel(%arg0: i32, %arg1: i32, %arg2: memref<8x128xf32, #tpu.memory_space<vmem>>, %arg3: memref<8x128xf32, #tpu.memory_space<vmem>>, %arg4: memref<128x128xf32, #tpu.memory_space<vmem>>, %arg5: memref<8x128xf32, #tpu.memory_space<vmem>>, %arg6: memref<8x128xf32, #tpu.memory_space<vmem>>) attributes {dimension_semantics = [#tpu.dimension_semantics<parallel>, #tpu.dimension_semantics<arbitrary>], iteration_bounds = array<i64: 2, 2>, scalar_prefetch = 0 : i64, scratch_operands = 1 : i64, tpu.core_type = #tpu.core_type<tc>, window_params = [{transform_indices = @transform_0, window_bounds = array<i64: 8, 128>}, {transform_indices = @transform_1, window_bounds = array<i64: 8, 128>}, {pipeline_mode = #tpu.pipeline_mode<synchronous>, transform_indices = @transform_2, window_bounds = array<i64: 128, 128>}, {transform_indices = @transform_3, window_bounds = array<i64: 8, 128>}]} {
    %c0_i32 = arith.constant 0 : i32
    %0 = arith.cmpi eq, %arg1, %c0_i32 : i32
    %1 = arith.extui %0 : i1 to i32
    %c0_i32_0 = arith.constant 0 : i32
    %2 = arith.cmpi ne, %1, %c0_i32_0 : i32
    scf.if %2 {
      %cst_13 = arith.constant 0.000000e+00 : f32
      %28 = vector.broadcast %cst_13 : f32 to vector<8x128xf32>
      %c0_14 = arith.constant 0 : index
      %c0_15 = arith.constant 0 : index
      %29 = vector.load %arg6[%c0_14, %c0_15] : memref<8x128xf32, #tpu.memory_space<vmem>>, vector<8x128xf32>
      tpu.vector_store %arg6[%c0_14, %c0_15], %28 {strides = array<i32>} : memref<8x128xf32, #tpu.memory_space<vmem>>, vector<8x128xf32>,
    } else {
    }
    %c2_i32 = arith.constant 2 : i32
    %3 = arith.muli %arg0, %c2_i32 : i32
    %4 = arith.addi %3, %arg1 : i32
    %c8_i32 = arith.constant 8 : i32
    %5 = arith.muli %4, %c8_i32 : i32
    %c20_i32 = arith.constant 20 : i32
    %6 = arith.subi %c20_i32, %5 : i32
    %7 = tpu.iota {dimensions = array<i32: 0>} : vector<8x1xi32>
    %8 = vector.broadcast %6 : i32 to vector<8x1xi32>
    %9 = arith.cmpi slt, %7, %8 : vector<8x1xi32>
    %c0 = arith.constant 0 : index
    %c0_1 = arith.constant 0 : index
    %10 = vector.load %arg2[%c0, %c0_1] : memref<8x128xf32, #tpu.memory_space<vmem>>, vector<8x128xf32>
    %c0_2 = arith.constant 0 : index
    %c0_3 = arith.constant 0 : index
    %11 = vector.load %arg3[%c0_2, %c0_3] : memref<8x128xf32, #tpu.memory_space<vmem>>, vector<8x128xf32>
    %12 = arith.subf %10, %11 : vector<8x128xf32>
    %cst = arith.constant 0.000000e+00 : f32
    %13 = vector.shape_cast %9 : vector<8x1xi1> to vector<8x1xi1>
    %14 = vector.broadcast %13 : vector<8x1xi1> to vector<8x128xi1>
    %15 = vector.broadcast %cst : f32 to vector<8x128xf32>
    %16 = arith.select %14, %12, %15 : vector<8x128xi1>, vector<8x128xf32>
    %c0_4 = arith.constant 0 : index
    %c0_5 = arith.constant 0 : index
    %17 = vector.load %arg4[%c0_4, %c0_5] : memref<128x128xf32, #tpu.memory_space<vmem>>, vector<128x128xf32>
    %cst_6 = arith.constant dense<0.000000e+00> : vector<8x128xf32>
    %18 = tpu.matmul %16, %17, %cst_6 {dimension_numbers = #tpu.dot_dimension_numbers<[1], [0], [0], [1], [0, 0, 1, 1], [], []>} : vector<8x128xf32>, vector<128x128xf32>, vector<8x128xf32> -> vector<8x128xf32>
    %19 = math.absf %18 : vector<8x128xf32>
    %c0_7 = arith.constant 0 : index
    %c0_8 = arith.constant 0 : index
    %20 = vector.load %arg6[%c0_7, %c0_8] : memref<8x128xf32, #tpu.memory_space<vmem>>, vector<8x128xf32>
    %21 = vector.shape_cast %19 : vector<8x128xf32> to vector<1x8x128xf32>
    %cst_9 = arith.constant dense<0.000000e+00> : vector<8x128xf32>
    %22 = vector.multi_reduction <add>, %21, %cst_9 [0] : vector<1x8x128xf32> to vector<8x128xf32>
    %23 = arith.addf %20, %22 : vector<8x128xf32>
    %c0_10 = arith.constant 0 : index
    %c0_11 = arith.constant 0 : index
    %24 = vector.load %arg6[%c0_10, %c0_11] : memref<8x128xf32, #tpu.memory_space<vmem>>, vector<8x128xf32>
    tpu.vector_store %arg6[%c0_10, %c0_11], %23 {strides = array<i32>} : memref<8x128xf32, #tpu.memory_space<vmem>>, vector<8x128xf32>,
    %c1_i32 = arith.constant 1 : i32
    %25 = arith.cmpi eq, %arg1, %c1_i32 : i32
    %26 = arith.extui %25 : i1 to i32
    %c0_i32_12 = arith.constant 0 : i32
    %27 = arith.cmpi ne, %26, %c0_i32_12 : i32
    scf.if %27 {
      %c0_13 = arith.constant 0 : index
      %c0_14 = arith.constant 0 : index
      %28 = vector.load %arg6[%c0_13, %c0_14] : memref<8x128xf32, #tpu.memory_space<vmem>>, vector<8x128xf32>
      %c0_15 = arith.constant 0 : index
      %c0_16 = arith.constant 0 : index
      %29 = vector.load %arg5[%c0_15, %c0_16] : memref<8x128xf32, #tpu.memory_space<vmem>>, vector<8x128xf32>
      tpu.vector_store %arg5[%c0_15, %c0_16], %28 {strides = array<i32>} : memref<8x128xf32, #tpu.memory_space<vmem>>, vector<8x128xf32>,
    } else {
    }
    return
  }
  func.func @transform_0(%arg0: i32, %arg1: i32) -> (i32, i32) {
    %c2_i32 = arith.constant 2 : i32
    %0 = arith.muli %arg0, %c2_i32 : i32
    %1 = arith.addi %0, %arg1 : i32
    %c2_i32_0 = arith.constant 2 : i32
    %2 = arith.minsi %1, %c2_i32_0 : i32
    %c0_i32 = arith.constant 0 : i32
    %c0_i32_1 = arith.constant 0 : i32
    return %2, %c0_i32 : i32, i32
  }
  func.func @transform_1(%arg0: i32, %arg1: i32) -> (i32, i32) {
    %c2_i32 = arith.constant 2 : i32
    %0 = arith.muli %arg0, %c2_i32 : i32
    %1 = arith.addi %0, %arg1 : i32
    %c2_i32_0 = arith.constant 2 : i32
    %2 = arith.minsi %1, %c2_i32_0 : i32
    %c0_i32 = arith.constant 0 : i32
    %c0_i32_1 = arith.constant 0 : i32
    return %2, %c0_i32 : i32, i32
  }
  func.func @transform_2(%arg0: i32, %arg1: i32) -> (i32, i32) {
    %c0_i32 = arith.constant 0 : i32
    %c0_i32_0 = arith.constant 0 : i32
    %c0_i32_1 = arith.constant 0 : i32
    return %c0_i32, %c0_i32_0 : i32, i32
  }
  func.func @transform_3(%arg0: i32, %arg1: i32) -> (i32, i32) {
    %c0_i32 = arith.constant 0 : i32
    %c0_i32_0 = arith.constant 0 : i32
    return %arg0, %c0_i32 : i32, i32
  }
}

module attributes {stable_mosaic.version = 11 : i64} {
  func.func @_cheb_loss_kernel(%arg0: i32, %arg1: i32, %arg2: memref<8x128xf32, #tpu.memory_space<vmem>>, %arg3: memref<8x128xf32, #tpu.memory_space<vmem>>, %arg4: memref<128x128xf32, #tpu.memory_space<vmem>>, %arg5: memref<8x128xf32, #tpu.memory_space<vmem>>, %arg6: memref<8x128xf32, #tpu.memory_space<vmem>>) attributes {dimension_semantics = [#tpu.dimension_semantics<parallel>, #tpu.dimension_semantics<arbitrary>], iteration_bounds = array<i64: 2, 2>, scalar_prefetch = 0 : i64, scratch_operands = 1 : i64, tpu.core_type = #tpu.core_type<tc>, window_params = [{transform_indices = @transform_0, window_bounds = array<i64: 8, 128>}, {transform_indices = @transform_1, window_bounds = array<i64: 8, 128>}, {pipeline_mode = #tpu.pipeline_mode<synchronous>, transform_indices = @transform_2, window_bounds = array<i64: 128, 128>}, {transform_indices = @transform_3, window_bounds = array<i64: 8, 128>}]} {
    %c0_i32 = arith.constant 0 : i32
    %0 = arith.cmpi eq, %arg1, %c0_i32 : i32
    %1 = arith.extui %0 : i1 to i32
    %c0_i32_0 = arith.constant 0 : i32
    %2 = arith.cmpi ne, %1, %c0_i32_0 : i32
    scf.if %2 {
      %cst_13 = arith.constant 0.000000e+00 : f32
      %28 = vector.broadcast %cst_13 : f32 to vector<8x128xf32>
      %c0_14 = arith.constant 0 : index
      %c0_15 = arith.constant 0 : index
      %29 = vector.load %arg6[%c0_14, %c0_15] : memref<8x128xf32, #tpu.memory_space<vmem>>, vector<8x128xf32>
      tpu.vector_store %arg6[%c0_14, %c0_15], %28 {strides = array<i32>} : memref<8x128xf32, #tpu.memory_space<vmem>>, vector<8x128xf32>,
    } else {
    }
    %c2_i32 = arith.constant 2 : i32
    %3 = arith.muli %arg0, %c2_i32 : i32
    %4 = arith.addi %3, %arg1 : i32
    %c8_i32 = arith.constant 8 : i32
    %5 = arith.muli %4, %c8_i32 : i32
    %c20_i32 = arith.constant 20 : i32
    %6 = arith.subi %c20_i32, %5 : i32
    %7 = tpu.iota {dimensions = array<i32: 0>} : vector<8x1xi32>
    %8 = vector.broadcast %6 : i32 to vector<8x1xi32>
    %9 = arith.cmpi slt, %7, %8 : vector<8x1xi32>
    %c0 = arith.constant 0 : index
    %c0_1 = arith.constant 0 : index
    %10 = vector.load %arg2[%c0, %c0_1] : memref<8x128xf32, #tpu.memory_space<vmem>>, vector<8x128xf32>
    %c0_2 = arith.constant 0 : index
    %c0_3 = arith.constant 0 : index
    %11 = vector.load %arg3[%c0_2, %c0_3] : memref<8x128xf32, #tpu.memory_space<vmem>>, vector<8x128xf32>
    %12 = arith.subf %10, %11 : vector<8x128xf32>
    %cst = arith.constant 0.000000e+00 : f32
    %13 = vector.shape_cast %9 : vector<8x1xi1> to vector<8x1xi1>
    %14 = vector.broadcast %13 : vector<8x1xi1> to vector<8x128xi1>
    %15 = vector.broadcast %cst : f32 to vector<8x128xf32>
    %16 = arith.select %14, %12, %15 : vector<8x128xi1>, vector<8x128xf32>
    %c0_4 = arith.constant 0 : index
    %c0_5 = arith.constant 0 : index
    %17 = vector.load %arg4[%c0_4, %c0_5] : memref<128x128xf32, #tpu.memory_space<vmem>>, vector<128x128xf32>
    %cst_6 = arith.constant dense<0.000000e+00> : vector<8x128xf32>
    %18 = tpu.matmul %16, %17, %cst_6 {dimension_numbers = #tpu.dot_dimension_numbers<[1], [0], [0], [1], [0, 0, 1, 1], [], []>} : vector<8x128xf32>, vector<128x128xf32>, vector<8x128xf32> -> vector<8x128xf32>
    %19 = math.absf %18 : vector<8x128xf32>
    %c0_7 = arith.constant 0 : index
    %c0_8 = arith.constant 0 : index
    %20 = vector.load %arg6[%c0_7, %c0_8] : memref<8x128xf32, #tpu.memory_space<vmem>>, vector<8x128xf32>
    %21 = vector.shape_cast %19 : vector<8x128xf32> to vector<1x8x128xf32>
    %cst_9 = arith.constant dense<0.000000e+00> : vector<8x128xf32>
    %22 = vector.multi_reduction <add>, %21, %cst_9 [0] : vector<1x8x128xf32> to vector<8x128xf32>
    %23 = arith.addf %20, %22 : vector<8x128xf32>
    %c0_10 = arith.constant 0 : index
    %c0_11 = arith.constant 0 : index
    %24 = vector.load %arg6[%c0_10, %c0_11] : memref<8x128xf32, #tpu.memory_space<vmem>>, vector<8x128xf32>
    tpu.vector_store %arg6[%c0_10, %c0_11], %23 {strides = array<i32>} : memref<8x128xf32, #tpu.memory_space<vmem>>, vector<8x128xf32>,
    %c1_i32 = arith.constant 1 : i32
    %25 = arith.cmpi eq, %arg1, %c1_i32 : i32
    %26 = arith.extui %25 : i1 to i32
    %c0_i32_12 = arith.constant 0 : i32
    %27 = arith.cmpi ne, %26, %c0_i32_12 : i32
    scf.if %27 {
      %c0_13 = arith.constant 0 : index
      %c0_14 = arith.constant 0 : index
      %28 = vector.load %arg6[%c0_13, %c0_14] : memref<8x128xf32, #tpu.memory_space<vmem>>, vector<8x128xf32>
      %c0_15 = arith.constant 0 : index
      %c0_16 = arith.constant 0 : index
      %29 = vector.load %arg5[%c0_15, %c0_16] : memref<8x128xf32, #tpu.memory_space<vmem>>, vector<8x128xf32>
      tpu.vector_store %arg5[%c0_15, %c0_16], %28 {strides = array<i32>} : memref<8x128xf32, #tpu.memory_space<vmem>>, vector<8x128xf32>,
    } else {
    }
    return
  }
  func.func @transform_0(%arg0: i32, %arg1: i32) -> (i32, i32) {
    %c2_i32 = arith.constant 2 : i32
    %0 = arith.muli %arg0, %c2_i32 : i32
    %1 = arith.addi %0, %arg1 : i32
    %c2_i32_0 = arith.constant 2 : i32
    %2 = arith.minsi %1, %c2_i32_0 : i32
    %c0_i32 = arith.constant 0 : i32
    %c0_i32_1 = arith.constant 0 : i32
    return %2, %c0_i32 : i32, i32
  }
  func.func @transform_1(%arg0: i32, %arg1: i32) -> (i32, i32) {
    %c2_i32 = arith.constant 2 : i32
    %0 = arith.muli %arg0, %c2_i32 : i32
    %1 = arith.addi %0, %arg1 : i32
    %c2_i32_0 = arith.constant 2 : i32
    %2 = arith.minsi %1, %c2_i32_0 : i32
    %c0_i32 = arith.constant 0 : i32
    %c0_i32_1 = arith.constant 0 : i32
    return %2, %c0_i32 : i32, i32
  }
  func.func @transform_2(%arg0: i32, %arg1: i32) -> (i32, i32) {
    %c0_i32 = arith.constant 0 : i32
    %c0_i32_0 = arith.constant 0 : i32
    %c0_i32_1 = arith.constant 0 : i32
    return %c0_i32, %c0_i32_0 : i32, i32
  }
  func.func @transform_3(%arg0: i32, %arg1: i32) -> (i32, i32) {
    %c0_i32 = arith.constant 0 : i32
    %c0_i32_0 = arith.constant 0 : i32
    return %arg0, %c0_i32 : i32, i32
  }
}

</mosaic_0001>

<bundles_post_ra>
// kernel: tpu_custom_call.1
= control target key start
LH: loop header
LB: loop body
LE: loop exit
PB: predicated region body
PF: predicated region fallthrough
CT: control target
= control target key end

     0   :  { %s1215_s0 = inlined_call_operand.hbm [shape: f32[20,128], index: 0, kind: input, shape index: {}]   ;;  %s1216_s1 = inlined_call_operand.hbm [shape: f32[20,128], index: 1, kind: input, shape index: {}]   ;;  %s1217_s2 = inlined_call_operand.hbm [shape: f32[128,128], index: 2, kind: input, shape index: {}]   ;;  %s1218_s3 = inlined_call_operand.hbm [shape: f32[16,128], index: 3, kind: output, shape index: {}]  }
   0x1   :  { %1226 = sst [smem:[#allocation19_spill]] %s1217_s2 }
   0x2   :  { %1227 = sst [smem:[#allocation20_spill]] %s1218_s3 }
   0x3   :  { %8 = vsyncpa [#allocation4], 0 }
   0x4   :  { %10 = vsyncpa [#allocation4 + $0x1], 0 }
   0x5   :  { %11 = vsyncpa [#allocation7], 0 }
   0x6   :  { %13 = vsyncpa [#allocation7 + $0x1], 0 }
   0x7   :  { %14 = vsyncpa [#allocation5], 0 }
   0x8   :  { %16 = vsyncpa [#allocation5 + $0x1], 0  ;;  %s969_s12 = smov 0   ;;  %s971_s13 = smov 0  }
   0x9   :  { %s973_s14 = smov 0   ;;  %s975_s15 = smov 0  }
   0xa   :  { %s977_s16 = smov 0   ;;  %s979_s17 = smov 0  }
   0xb   :  { %s981_s18 = smov 0   ;;  %s983_s19 = smov 0  }
   0xc   :  { %s985_s20 = smov 0   ;;  %s987_s21 = smov 0  }
   0xd   :  { %s989_s22 = smov 0  }
   0xe LB: > { %1228 = sst [smem:[#allocation14_spill]] %s898_s12  ;;  %s1023_s23 = sadd.s32 4294967295, %s938_s22   ;;  %s938_s22 = sphi %s989_s22, %s22_s22   ;;  %s934_s21 = sphi %s987_s21, %s1257_s21   ;;  %s930_s20 = sphi %s985_s20, %s1256_s20   ;;  %s926_s19 = sphi %s983_s19, %s1255_s19   ;;  %s922_s18 = sphi %s981_s18, %s1248_s18   ;;  %s918_s17 = sphi %s979_s17, %s1254_s17   ;;  %s914_s16 = sphi %s977_s16, %s1253_s16   ;;  %s910_s15 = sphi %s975_s15, %s1252_s15   ;;  %s906_s14 = sphi %s973_s14, %s1251_s14   ;;  %s902_s13 = sphi %s971_s13, %s1250_s13   ;;  %s898_s12 = sphi %s969_s12, %s1249_s12  }
   0xf   : > { %1229 = sst [smem:[#allocation15_spill]] %s926_s19  ;;  %s525_s24 = sadd.s32 4294967294, %s938_s22  }
  0x10   : > { %1230 = sst [smem:[#allocation16_spill]] %s930_s20  ;;  %p62_p0 = scmp.ne.s32.totalorder %s914_s16, %s910_s15 }
  0x11   : > { %p63_p1 = scmp.eq.s32.totalorder %s1023_s23, 0  ;;  %s130_s25 = sadd.s32 1, %s906_s14 }
  0x12   : > { %p140_p2 = scmp.ne.s32.totalorder %s906_s14, %s902_s13  ;;  %p141_p4 = scmp.eq.s32.totalorder %s1023_s23, 3 }
  0x13   : > { %p1033_p3 = por %p63_p1, %p62_p0  ;;  %p146_p5 = scmp.ne.s32.totalorder %s902_s13, %s898_s12 }
  0x14   : > { %p147_p6 = scmp.eq.s32.totalorder %s525_s24, 3  ;;  %p1040_p7 = por %p141_p4, %p140_p2 }
  0x15   : > { %p530_p8 = scmp.ge.s32.totalorder %s938_s22, 1  ;;  %p154_p10 = scmp.lt.s32.totalorder %s938_s22, 5 }
  0x16   : > { %s1232_s27 = scalar_select %p1040_p7, 1, 0 }
  0x17   : > { %p1045_p9 = por %p147_p6, %p146_p5  ;;  %p1050_p11 = pnand %p530_p8, %p154_p10 }
  0x18   : > { %1233 = sst [smem:[#allocation17_spill]] %s1232_s27  ;;  %s940_s30 = smov [#allocation8]  }
  0x19   : > { %s1234_s28 = scalar_select %p1045_p9, 1, 0 }
  0x1a   : > { %s166_s4 = sshll.u32 %s940_s30, 4  ;;  %p615_p12 = pneg %p1050_p11  ;;  %s167_s4 = int_to_ptr.vmem [resolvable:$true] %s166_s4 }
  0x1b   : > { %1235 = sst [smem:[#allocation18_spill]] %s1234_s28  ;;  %s739_s5 = scalar_lea.vmem %s167_s4, 2048 }
  0x1c   : > { %p616_p13 = pnand %p615_p12, %p63_p1  ;;  %p740_p2 = scmp.ne.s32.totalorder %s167_s4, %s739_s5 }
  0x1d   : > { %p747_p6 = scmp.lt.s32.totalorder %s167_s4, %s167_s4  ;;  %p748_p9 = scmp.lt.s32.totalorder %s739_s5, %s739_s5 }
  0x1e   : > { %p730_p0 = pneg %p616_p13 }
  0x1f   : > { %p749_p7 = por %p748_p9, %p747_p6 }
  0x20   : > { %p742_p4 = pnand %p740_p2, %p730_p0 }
  0x22   : > { %p743_p5 = pneg %p742_p4 }
  0x24   : > { %p750_p8 = pnand %p749_p7, %p743_p5 }
  0x26   : > { %753 = shalt.err (!%p750_p8)
}
  0x27   : > { %s941_s6 = smov 128   ;;  %s942_s7 = smov 8  }
  0x28   : > { %s1237_s2 = sld [smem:[#allocation19_spill]]  ;;  %s31_s10 = sadd.s32 1, %s930_s20 }
  0x29   : > { %p32_p9 = scmp.ge.s32.totalorder %s31_s10, 2  ;;  %s34_s11 = sadd.s32 1, %s934_s21 }
  0x2a   : > { %s526_s15 = sshll.u32 %s934_s21, 1  ;;  %s49_s24 = sadd.s32 1, %s918_s17 }
  0x2b   : > { %s1259_s10 = smov (%p32_p9, %s31_s10), 0  ;;  %s1261_s11 = smov (!%p32_p9, %s34_s11), %s934_s21 }
  0x2c   : > { %s39_s30 = sadd.s32 %s930_s20, %s526_s15  ;;  %p56_p7 = scmp.ne.s32.totalorder %s918_s17, %s914_s16 }
  0x2d   : > { %p36_p10 = scmp.ge.s32.totalorder %s1261_s11, 2  ;;  %p40_p12 = scmp.lt.s32.totalorder %s39_s30, 2 }
  0x2e   : > { %618 = dma.hbm_to_vmem [thread:$0]  (!%p616_p13), %s1237_s2, 2048, %s167_s4, [#allocation7], %s941_s6, %s941_s6, %s942_s7  }
  0x2f   : > { %p57_p0 = scmp.eq.s32.totalorder %s938_s22, 0  ;;  %p631_p2 = scmp.lt.s32.totalorder %s938_s22, 4 }
  0x30   : > { %s1263_s11 = smov (%p36_p10, %s1261_s11), 0  ;;  %s1265_s30 = smov (!%p40_p12, %s39_s30), 2 }
  0x31   : > { %s527_s4 = sshll.u32 %s1263_s11, 1  ;;  %p1076_p13 = por %p57_p0, %p56_p7 }
  0x32   : > { %s43_s6 = sadd.s32 %s527_s4, %s1259_s10  ;;  %s127_s7 = ssub.s32 %s934_s21, %s1263_s11 }
  0x33   : > { %p44_p4 = scmp.lt.s32.totalorder %s43_s6, 2  ;;  %p128_p5 = scmp.eq.s32.totalorder %s127_s7, 0 }
  0x34   : > { %s180_s8 = sand.u32 1, %s918_s17   ;;  %s535_s9 = sshll.u32 %s1265_s30, 7 }
  0x35   : > { %s1267_s6 = smov (!%p44_p4, %s43_s6), 2  ;;  %s533_s20 = sshll.u32 %s180_s8, 3 }
  0x36   : > { %s1087_s15 = scalar_select %p128_p5, %s906_s14, %s130_s25  }
  0x37   : > { %s46_s2 = ssub.s32 %s1265_s30, %s1267_s6  ;;  %s193_s3 = scalar_lea.hbm %s1215_s0, %s535_s9 }
  0x38   : > { %p47_p6 = scmp.eq.s32.totalorder %s46_s2, 0  ;;  %s184_s19 = scalar_lea.vmem [#allocation3], %s533_s20 }
  0x39   : > { %s195_s4 = sshll.u32 %s184_s19, 4  ;;  %p1099_p8 = pnand %p631_p2, %p1076_p13  ;;  %s196_s4 = int_to_ptr.vmem [resolvable:$true] %s195_s4 }
  0x3a   : > { %s1093_s27 = scalar_select %p47_p6, %s918_s17, %s49_s24  }
  0x3b   : > { %s1106_s30 = scalar_lea.hbm %s1216_s1, %s535_s9  ;;  %s181_s12 = scalar_lea.sflag [#allocation4], %s180_s8 }
  0x3c   : > { %p756_p9 = pneg %p1099_p8  ;;  %s767_s28 = scalar_lea.vmem %s196_s4, 128 }
  0x3d   : > { %p768_p7 = scmp.ne.s32.totalorder %s196_s4, %s767_s28  ;;  %s943_s19 = smov [#allocation3]  }
  0x3e   : > { %s772_s24 = sshll.u32 %s943_s19, 4  ;;  %s773_s24 = int_to_ptr.vmem [resolvable:$false] %s772_s24 }
  0x3f   : > { %p770_p10 = pnand %p768_p7, %p756_p9  ;;  %s774_s5 = scalar_lea.vmem %s773_s24, 256 }
  0x40   : > { %p775_p0 = scmp.lt.s32.totalorder %s196_s4, %s773_s24  ;;  %p776_p2 = scmp.lt.s32.totalorder %s774_s5, %s767_s28 }
  0x41   : > { %p771_p12 = pneg %p770_p10 }
  0x42   : > { %p777_p13 = por %p776_p2, %p775_p0 }
  0x44   : > { %p778_p4 = pnand %p777_p13, %p771_p12 }
  0x46   : > { %781 = shalt.err (!%p778_p4)
}
  0x47   : > { %622 = dma.hbm_to_vmem [thread:$0]  (!%p1099_p8), %s193_s3, 128, %s196_s4, %s181_s12  }
  0x48   : > { %s202_s6 = sand.u32 1, %s938_s22   ;;  %s206_s8 = scalar_lea.vmem [#allocation6], %s533_s20 }
  0x49   : > { %s217_s9 = sshll.u32 %s206_s8, 4  ;;  %s203_s25 = scalar_lea.sflag [#allocation7], %s202_s6  ;;  %s218_s9 = int_to_ptr.vmem [resolvable:$true] %s217_s9 }
  0x4a   : > { %s795_s2 = scalar_lea.vmem %s218_s9, 128  ;;  %s944_s28 = smov [#allocation6]  }
  0x4b   : > { %p796_p5 = scmp.ne.s32.totalorder %s218_s9, %s795_s2  ;;  %s800_s19 = sshll.u32 %s944_s28, 4  ;;  %s801_s19 = int_to_ptr.vmem [resolvable:$false] %s800_s19 }
  0x4c   : > { %s802_s24 = scalar_lea.vmem %s801_s19, 256  ;;  %p803_p10 = scmp.lt.s32.totalorder %s218_s9, %s801_s19 }
  0x4d   : > { %p798_p6 = pnand %p796_p5, %p756_p9  ;;  %p804_p12 = scmp.lt.s32.totalorder %s802_s24, %s795_s2 }
  0x4f   : > { %p799_p7 = pneg %p798_p6  ;;  %p805_p0 = por %p804_p12, %p803_p10 }
  0x51   : > { %p806_p2 = pnand %p805_p0, %p799_p7 }
  0x53   : > { %809 = shalt.err (!%p806_p2)
}
  0x54   : > { %625 = dma.hbm_to_vmem [thread:$0]  (!%p1099_p8), %s1106_s30, 128, %s218_s9, %s203_s25  }
  0x55   : > { %226 = sbr.rel (%p1050_p11) target bundleno = 371 (0x173), region = 32  ;;  %s228_s3 = sand.u32 (!%p1050_p11), 1, %s914_s16  }
  0x56   : > { %s1125_s20 = sshll.u32 (!%p1050_p11), %s228_s3, 3  ;;  %s229_s4 = scalar_lea.sflag (!%p1050_p11), [#allocation4], %s228_s3 }
  0x57   : > { %s232_s12 = scalar_lea.vmem (!%p1050_p11), [#allocation3], %s1125_s20 }
  0x5a   : > { %881 = dma.done.wait (%p1033_p3), %s229_s4, 128  }
  0x5b   : > { %883 = vsyncadd (%p1033_p3), %s229_s4, 4294967168  ;;  %s237_s7 = sand.u32 1, %s1023_s23   ;;  %s241_s29 = scalar_lea.vmem [#allocation6], %s1125_s20 }
  0x5c   : > { %s238_s30 = scalar_lea.sflag [#allocation7], %s237_s7 }
  0x5d   : > { %885 = dma.done.wait (%p1033_p3), %s238_s30, 128  }
  0x5e   : > { %887 = vsyncadd (%p1033_p3), %s238_s30, 4294967168 }
  0x5f   : > { %889 = dma.done.wait (%p63_p1), [#allocation7], 2048  }
  0x60   : > { %891 = vsyncadd (%p63_p1), [#allocation7], 4294965248  ;;  %s270_s5 = sand.u32 1, %s902_s13   ;;  %p544_p11 = scmp.ne.s32.totalorder %s922_s18, 0 }
  0x61   : > { %s1145_s6 = sshll.u32 %s270_s5, 3 }
  0x62   : > { %s272_s8 = scalar_lea.vmem [#allocation9], %s1145_s6  ;;  %284 = sbr.rel (%p544_p11) target bundleno = 105 (0x69), region = 48 }
  0x67   : > { %v945_v0 = vmov 0.0  }
  0x68   : > { %285 = vst [vmem:[#allocation2] sm:$0xff] %v945_v0 }
  0x69 PF: > { %v315_v1 = vld [vmem:[#allocation8 + $0x78] sm:$0xff]  ;;  %v946_v2 = vmov 0.0   ;;  %v314_v3 = vld [vmem:[#allocation8 + $0x70] sm:$0xff]  ;;  %vm947_vm0 = vmmov 0   ;;  %v313_v4 = vld [vmem:[#allocation8 + $0x68] sm:$0xff]  ;;  %s1240_s23 = sld [smem:[#allocation15_spill]]  ;;  %v290_v14 = vlaneseq }
  0x6a   : > { %570 = vmatprep.subr.mxu0 %v946_v2  ;;  %602 = vmatprep.mubr.msk.f32.mxu0 %vm947_vm0, %v946_v2  ;;  %v312_v5 = vld [vmem:[#allocation8 + $0x60] sm:$0xff]  ;;  %v311_v6 = vld [vmem:[#allocation8 + $0x58] sm:$0xff]  ;;  %v310_v7 = vld [vmem:[#allocation8 + $0x50] sm:$0xff]  ;;  %p548_p1 = scmp.ne.s32.totalorder %s922_s18, 1 }
  0x6b   : > { %571 = vmatpush3.msra.mxu0 %v315_v1  ;;  %v309_v8 = vld [vmem:[#allocation8 + $0x48] sm:$0xff]  ;;  %v308_v9 = vld [vmem:[#allocation8 + $0x40] sm:$0xff]  ;;  %v307_v10 = vld [vmem:[#allocation8 + $0x38] sm:$0xff]  ;;  %v291_v17 = vshrl.u32 %v290_v14, 7 }
  0x6c   : > { %572 = vmatprep.subr.mxu0 %v946_v2  ;;  %v306_v11 = vld [vmem:[#allocation8 + $0x30] sm:$0xff]  ;;  %v305_v12 = vld [vmem:[#allocation8 + $0x28] sm:$0xff]  ;;  %v304_v13 = vld [vmem:[#allocation8 + $0x20] sm:$0xff] }
  0x6d   : > { %573 = vmatpush3.msra.mxu0 %v314_v3  ;;  %v303_v15 = vld [vmem:[#allocation8 + $0x18] sm:$0xff]  ;;  %v302_v16 = vld [vmem:[#allocation8 + $0x10] sm:$0xff]  ;;  %v294_v18 = vld [vmem:[%s232_s12] sm:$0xff] }
  0x6e   : > { %574 = vmatprep.subr.mxu0 %v946_v2  ;;  %v295_v19 = vld [vmem:[%s241_s29] sm:$0xff]  ;;  %v301_v20 = vld [vmem:[#allocation8 + $0x8] sm:$0xff]  ;;  %v300_v22 = vld [vmem:[#allocation8] sm:$0xff] }
  0x6f   : > { %575 = vmatpush3.msra.mxu0 %v313_v4  ;;  %s545_s26 = sshll.u32 %s1240_s23, 1  ;;  %v296_v23 = vsub.f32 %v294_v18, %v295_v19  ;;  %v387_v25 = vld [vmem:[#allocation2] sm:$0xff] }
  0x70   : > { %576 = vmatprep.subr.mxu0 %v946_v2  ;;  %s287_s9 = sadd.s32 %s922_s18, %s545_s26 }
  0x71   : > { %577 = vmatpush3.msra.mxu0 %v312_v5  ;;  %s546_s25 = sshll.u32 %s287_s9, 3 }
  0x72   : > { %578 = vmatprep.subr.mxu0 %v946_v2  ;;  %s289_s2 = ssub.s32 20, %s546_s25 }
  0x73   : > { %579 = vmatpush3.msra.mxu0 %v311_v6  ;;  %v292_v21 = vstv %s289_s2 }
  0x74   : > { %580 = vmatprep.subr.mxu0 %v946_v2  ;;  %vm293_vm1 = vcmp.lt.s32.totalorder %v291_v17, %v292_v21 }
  0x75   : > { %581 = vmatpush3.msra.mxu0 %v310_v7 }
  0x76   : > { %582 = vmatprep.subr.mxu0 %v946_v2 }
  0x77   : > { %583 = vmatpush3.msra.mxu0 %v309_v8 }
  0x78   : > { %584 = vmatprep.subr.mxu0 %v946_v2 }
  0x79   : > { %585 = vmatpush3.msra.mxu0 %v308_v9 }
  0x7a   : > { %586 = vmatprep.subr.mxu0 %v946_v2 }
  0x7b   : > { %587 = vmatpush3.msra.mxu0 %v307_v10 }
  0x7c   : > { %588 = vmatprep.subr.mxu0 %v946_v2 }
  0x7d   : > { %589 = vmatpush3.msra.mxu0 %v306_v11 }
  0x7e   : > { %590 = vmatprep.subr.mxu0 %v946_v2 }
  0x7f   : > { %591 = vmatpush3.msra.mxu0 %v305_v12 }
  0x80   : > { %592 = vmatprep.subr.mxu0 %v946_v2 }
  0x81   : > { %593 = vmatpush3.msra.mxu0 %v304_v13 }
  0x82   : > { %594 = vmatprep.subr.mxu0 %v946_v2 }
  0x83   : > { %595 = vmatpush3.msra.mxu0 %v303_v15 }
  0x84   : > { %596 = vmatprep.subr.mxu0 %v946_v2 }
  0x85   : > { %597 = vmatpush3.msra.mxu0 %v302_v16 }
  0x86   : > { %598 = vmatprep.subr.mxu0 %v946_v2 }
  0x87   : > { %599 = vmatpush3.msra.mxu0 %v301_v20 }
  0x88   : > { %600 = vmatprep.subr.mxu0 %v946_v2 }
  0x89   : > { %601 = vmatpush3.msra.mxu0 %v300_v22 }
  0x8a   : > { %603 = vmatmul.mubr.msk.f32.vlgmr.msra.gmra.mxu0 %vm293_vm1, %v296_v23 }
 0x14a   : > { %v382_v24 = vpop.f32.mrf.mxu0 }
 0x14b   : > { %v386_v26 = vand.u32 2147483647, %v382_v24  ;;  %394 = sbr.rel (%p548_p1) target bundleno = 344 (0x158), region = 52 }
 0x14c   : > { %v604_v27 = vpop.f32.mrf.mxu0 }
 0x14d   : > { %v389_v28 = vadd.f32 %v387_v25, %v386_v26 }
 0x14f   : > { %390 = vst [vmem:[#allocation2] sm:$0xff] %v389_v28 }
 0x156   : > { %v395_v29 = vld [vmem:[#allocation2] sm:$0xff] }
 0x157   : > { %396 = vst [vmem:[%s272_s8] sm:$0xff] %v395_v29 }
 0x158 PF: > { %s1241_s28 = sld [smem:[#allocation15_spill]]  ;;  %s411_s7 = sshll.u32 %s272_s8, 4  ;;  %s412_s7 = int_to_ptr.vmem [resolvable:$true] %s411_s7 }
 0x159   : > { %s1242_s19 = sld [smem:[#allocation17_spill]]  ;;  %s398_s18 = scalar_lea.sflag [#allocation5], %s270_s5 }
 0x15a   : > { %s1243_s4 = sld [smem:[#allocation20_spill]]  ;;  %s810_s30 = scalar_lea.vmem %s412_s7, 128 }
 0x15b   : > { %p811_p3 = scmp.ne.s32.totalorder %s412_s7, %s810_s30  ;;  %s948_s29 = smov [#allocation9]  }
 0x15c   : > { %s814_s23 = sshll.u32 %s948_s29, 4  ;;  %s815_s23 = int_to_ptr.vmem [resolvable:$false] %s814_s23 }
 0x15d   : > { %s816_s26 = scalar_lea.vmem %s815_s23, 256  ;;  %p817_p4 = scmp.lt.s32.totalorder %s412_s7, %s815_s23 }
 0x15e   : > { %s550_s24 = sshll.u32 %s1241_s28, 7  ;;  %p818_p5 = scmp.lt.s32.totalorder %s816_s26, %s810_s30 }
 0x15f   : > { %p1244_p8 = scmp.ne.s32.totalorder %s1242_s19, 0 }
 0x160   : > { %s409_s12 = scalar_lea.hbm %s1243_s4, %s550_s24  ;;  %p819_p6 = por %p818_p5, %p817_p4 }
 0x161   : > { %p812_p9 = pnand %p811_p3, %p1244_p8 }
 0x163   : > { %p813_p13 = pneg %p812_p9 }
 0x165   : > { %p820_p7 = pnand %p819_p6, %p813_p13 }
 0x167   : > { %823 = shalt.err (!%p820_p7)
}
 0x168   : > { %s824_s9 = scalar_lea.hbm %s409_s12, 128  ;;  %s828_s8 = scalar_lea.hbm %s1243_s4, 256 }
 0x169   : > { %p825_p10 = scmp.ne.s32.totalorder %s409_s12, %s824_s9  ;;  %p829_p2 = scmp.lt.s32.totalorder %s409_s12, %s1243_s4 }
 0x16a   : > { %p830_p11 = scmp.lt.s32.totalorder %s828_s8, %s824_s9 }
 0x16b   : > { %p826_p12 = pnand %p825_p10, %p1244_p8 }
 0x16c   : > { %p831_p1 = por %p830_p11, %p829_p2 }
 0x16d   : > { %p827_p0 = pneg %p826_p12 }
 0x16f   : > { %p832_p3 = pnand %p831_p1, %p827_p0 }
 0x171   : > { %835 = shalt.err (!%p832_p3)
}
 0x172   : > { %613 = dma.vmem_to_hbm [thread:$0]  (%p1244_p8), %s412_s7, 128, %s409_s12, %s398_s18  }
 0x173 PF: > { %s1245_s28 = sld [smem:[#allocation14_spill]]  ;;  %p633_p9 = scmp.ge.s32.totalorder %s938_s22, 2 }
 0x174   : > { %s1246_s24 = sld [smem:[#allocation18_spill]] }
 0x179   : > { %s423_s3 = sand.u32 1, %s1245_s28  }
 0x17a   : > { %p1247_p13 = scmp.ne.s32.totalorder %s1246_s24, 0  ;;  %s424_s20 = scalar_lea.sflag [#allocation5], %s423_s3 }
 0x17c   : > { %p627_p4 = pnand %p633_p9, %p1247_p13 }
 0x17e   : > { %p628_p5 = pneg %p627_p4 }
 0x180   : > { %893 = dma.done.wait (%p628_p5), %s424_s20, 128  }
 0x181   : > { %895 = vsyncadd (%p628_p5), %s424_s20, 4294967168  ;;  %s22_s22 = sadd.s32 1, %s938_s22   ;;  %s1248_s18 = sld [smem:[#allocation16_spill]] }
 0x182   : > { %p19_p6 = scmp.ge.s32.totalorder %s22_s22, 6   ;;  %s1249_s12 = smov %s902_s13 }
 0x183   : > { %s1250_s13 = smov %s906_s14  ;;  %s1251_s14 = smov %s1087_s15 }
 0x184   : > { %s1252_s15 = smov %s914_s16  ;;  %s1253_s16 = smov %s918_s17 }
 0x185   : > { %s1254_s17 = smov %s1093_s27  ;;  %s1255_s19 = smov %s934_s21 }
 0x186   : > { %s1256_s20 = smov %s1259_s10  ;;  %s1257_s21 = smov %s1263_s11 }
 0x187   :  { %21 = sbr.rel (!%p19_p6) target bundleno = 14 (0xe), region = 102 }
 0x18c   :  { %429 = vsyncpa [#allocation4], 1 }
 0x18d   :  { %431 = vsyncpa [#allocation4 + $0x1], 1 }
 0x18e   :  { %432 = vsyncpa [#allocation7], 1 }
 0x18f   :  { %434 = vsyncpa [#allocation7 + $0x1], 1 }
 0x190   :  { %435 = vsyncpa [#allocation5], 1 }
 0x191   :  { %437 = vsyncpa [#allocation5 + $0x1], 1 }

// kernel: tpu_custom_call.1
= control target key start
LH: loop header
LB: loop body
LE: loop exit
PB: predicated region body
PF: predicated region fallthrough
CT: control target
= control target key end

     0   :  { %s1215_s0 = inlined_call_operand.hbm [shape: f32[20,128], index: 0, kind: input, shape index: {}]   ;;  %s1216_s1 = inlined_call_operand.hbm [shape: f32[20,128], index: 1, kind: input, shape index: {}]   ;;  %s1217_s2 = inlined_call_operand.hbm [shape: f32[128,128], index: 2, kind: input, shape index: {}]   ;;  %s1218_s3 = inlined_call_operand.hbm [shape: f32[16,128], index: 3, kind: output, shape index: {}]  }
   0x1   :  { %1226 = sst [smem:[#allocation19_spill]] %s1217_s2 }
   0x2   :  { %1227 = sst [smem:[#allocation20_spill]] %s1218_s3 }
   0x3   :  { %8 = vsyncpa [#allocation4], 0 }
   0x4   :  { %10 = vsyncpa [#allocation4 + $0x1], 0 }
   0x5   :  { %11 = vsyncpa [#allocation7], 0 }
   0x6   :  { %13 = vsyncpa [#allocation7 + $0x1], 0 }
   0x7   :  { %14 = vsyncpa [#allocation5], 0 }
   0x8   :  { %16 = vsyncpa [#allocation5 + $0x1], 0  ;;  %s969_s12 = smov 0   ;;  %s971_s13 = smov 0  }
   0x9   :  { %s973_s14 = smov 0   ;;  %s975_s15 = smov 0  }
   0xa   :  { %s977_s16 = smov 0   ;;  %s979_s17 = smov 0  }
   0xb   :  { %s981_s18 = smov 0   ;;  %s983_s19 = smov 0  }
   0xc   :  { %s985_s20 = smov 0   ;;  %s987_s21 = smov 0  }
   0xd   :  { %s989_s22 = smov 0  }
   0xe LB: > { %1228 = sst [smem:[#allocation14_spill]] %s898_s12  ;;  %s1023_s23 = sadd.s32 4294967295, %s938_s22   ;;  %s938_s22 = sphi %s989_s22, %s22_s22   ;;  %s934_s21 = sphi %s987_s21, %s1257_s21   ;;  %s930_s20 = sphi %s985_s20, %s1256_s20   ;;  %s926_s19 = sphi %s983_s19, %s1255_s19   ;;  %s922_s18 = sphi %s981_s18, %s1248_s18   ;;  %s918_s17 = sphi %s979_s17, %s1254_s17   ;;  %s914_s16 = sphi %s977_s16, %s1253_s16   ;;  %s910_s15 = sphi %s975_s15, %s1252_s15   ;;  %s906_s14 = sphi %s973_s14, %s1251_s14   ;;  %s902_s13 = sphi %s971_s13, %s1250_s13   ;;  %s898_s12 = sphi %s969_s12, %s1249_s12  }
   0xf   : > { %1229 = sst [smem:[#allocation15_spill]] %s926_s19  ;;  %s525_s24 = sadd.s32 4294967294, %s938_s22  }
  0x10   : > { %1230 = sst [smem:[#allocation16_spill]] %s930_s20  ;;  %p62_p0 = scmp.ne.s32.totalorder %s914_s16, %s910_s15 }
  0x11   : > { %p63_p1 = scmp.eq.s32.totalorder %s1023_s23, 0  ;;  %s130_s25 = sadd.s32 1, %s906_s14 }
  0x12   : > { %p140_p2 = scmp.ne.s32.totalorder %s906_s14, %s902_s13  ;;  %p141_p4 = scmp.eq.s32.totalorder %s1023_s23, 3 }
  0x13   : > { %p1033_p3 = por %p63_p1, %p62_p0  ;;  %p146_p5 = scmp.ne.s32.totalorder %s902_s13, %s898_s12 }
  0x14   : > { %p147_p6 = scmp.eq.s32.totalorder %s525_s24, 3  ;;  %p1040_p7 = por %p141_p4, %p140_p2 }
  0x15   : > { %p530_p8 = scmp.ge.s32.totalorder %s938_s22, 1  ;;  %p154_p10 = scmp.lt.s32.totalorder %s938_s22, 5 }
  0x16   : > { %s1232_s27 = scalar_select %p1040_p7, 1, 0 }
  0x17   : > { %p1045_p9 = por %p147_p6, %p146_p5  ;;  %p1050_p11 = pnand %p530_p8, %p154_p10 }
  0x18   : > { %1233 = sst [smem:[#allocation17_spill]] %s1232_s27  ;;  %s940_s30 = smov [#allocation8]  }
  0x19   : > { %s1234_s28 = scalar_select %p1045_p9, 1, 0 }
  0x1a   : > { %s166_s4 = sshll.u32 %s940_s30, 4  ;;  %p615_p12 = pneg %p1050_p11  ;;  %s167_s4 = int_to_ptr.vmem [resolvable:$true] %s166_s4 }
  0x1b   : > { %1235 = sst [smem:[#allocation18_spill]] %s1234_s28  ;;  %s739_s5 = scalar_lea.vmem %s167_s4, 2048 }
  0x1c   : > { %p616_p13 = pnand %p615_p12, %p63_p1  ;;  %p740_p2 = scmp.ne.s32.totalorder %s167_s4, %s739_s5 }
  0x1d   : > { %p747_p6 = scmp.lt.s32.totalorder %s167_s4, %s167_s4  ;;  %p748_p9 = scmp.lt.s32.totalorder %s739_s5, %s739_s5 }
  0x1e   : > { %p730_p0 = pneg %p616_p13 }
  0x1f   : > { %p749_p7 = por %p748_p9, %p747_p6 }
  0x20   : > { %p742_p4 = pnand %p740_p2, %p730_p0 }
  0x22   : > { %p743_p5 = pneg %p742_p4 }
  0x24   : > { %p750_p8 = pnand %p749_p7, %p743_p5 }
  0x26   : > { %753 = shalt.err (!%p750_p8)
}
  0x27   : > { %s941_s6 = smov 128   ;;  %s942_s7 = smov 8  }
  0x28   : > { %s1237_s2 = sld [smem:[#allocation19_spill]]  ;;  %s31_s10 = sadd.s32 1, %s930_s20 }
  0x29   : > { %p32_p9 = scmp.ge.s32.totalorder %s31_s10, 2  ;;  %s34_s11 = sadd.s32 1, %s934_s21 }
  0x2a   : > { %s526_s15 = sshll.u32 %s934_s21, 1  ;;  %s49_s24 = sadd.s32 1, %s918_s17 }
  0x2b   : > { %s1259_s10 = smov (%p32_p9, %s31_s10), 0  ;;  %s1261_s11 = smov (!%p32_p9, %s34_s11), %s934_s21 }
  0x2c   : > { %s39_s30 = sadd.s32 %s930_s20, %s526_s15  ;;  %p56_p7 = scmp.ne.s32.totalorder %s918_s17, %s914_s16 }
  0x2d   : > { %p36_p10 = scmp.ge.s32.totalorder %s1261_s11, 2  ;;  %p40_p12 = scmp.lt.s32.totalorder %s39_s30, 2 }
  0x2e   : > { %618 = dma.hbm_to_vmem [thread:$0]  (!%p616_p13), %s1237_s2, 2048, %s167_s4, [#allocation7], %s941_s6, %s941_s6, %s942_s7  }
  0x2f   : > { %p57_p0 = scmp.eq.s32.totalorder %s938_s22, 0  ;;  %p631_p2 = scmp.lt.s32.totalorder %s938_s22, 4 }
  0x30   : > { %s1263_s11 = smov (%p36_p10, %s1261_s11), 0  ;;  %s1265_s30 = smov (!%p40_p12, %s39_s30), 2 }
  0x31   : > { %s527_s4 = sshll.u32 %s1263_s11, 1  ;;  %p1076_p13 = por %p57_p0, %p56_p7 }
  0x32   : > { %s43_s6 = sadd.s32 %s527_s4, %s1259_s10  ;;  %s127_s7 = ssub.s32 %s934_s21, %s1263_s11 }
  0x33   : > { %p44_p4 = scmp.lt.s32.totalorder %s43_s6, 2  ;;  %p128_p5 = scmp.eq.s32.totalorder %s127_s7, 0 }
  0x34   : > { %s180_s8 = sand.u32 1, %s918_s17   ;;  %s535_s9 = sshll.u32 %s1265_s30, 7 }
  0x35   : > { %s1267_s6 = smov (!%p44_p4, %s43_s6), 2  ;;  %s533_s20 = sshll.u32 %s180_s8, 3 }
  0x36   : > { %s1087_s15 = scalar_select %p128_p5, %s906_s14, %s130_s25  }
  0x37   : > { %s46_s2 = ssub.s32 %s1265_s30, %s1267_s6  ;;  %s193_s3 = scalar_lea.hbm %s1215_s0, %s535_s9 }
  0x38   : > { %p47_p6 = scmp.eq.s32.totalorder %s46_s2, 0  ;;  %s184_s19 = scalar_lea.vmem [#allocation3], %s533_s20 }
  0x39   : > { %s195_s4 = sshll.u32 %s184_s19, 4  ;;  %p1099_p8 = pnand %p631_p2, %p1076_p13  ;;  %s196_s4 = int_to_ptr.vmem [resolvable:$true] %s195_s4 }
  0x3a   : > { %s1093_s27 = scalar_select %p47_p6, %s918_s17, %s49_s24  }
  0x3b   : > { %s1106_s30 = scalar_lea.hbm %s1216_s1, %s535_s9  ;;  %s181_s12 = scalar_lea.sflag [#allocation4], %s180_s8 }
  0x3c   : > { %p756_p9 = pneg %p1099_p8  ;;  %s767_s28 = scalar_lea.vmem %s196_s4, 128 }
  0x3d   : > { %p768_p7 = scmp.ne.s32.totalorder %s196_s4, %s767_s28  ;;  %s943_s19 = smov [#allocation3]  }
  0x3e   : > { %s772_s24 = sshll.u32 %s943_s19, 4  ;;  %s773_s24 = int_to_ptr.vmem [resolvable:$false] %s772_s24 }
  0x3f   : > { %p770_p10 = pnand %p768_p7, %p756_p9  ;;  %s774_s5 = scalar_lea.vmem %s773_s24, 256 }
  0x40   : > { %p775_p0 = scmp.lt.s32.totalorder %s196_s4, %s773_s24  ;;  %p776_p2 = scmp.lt.s32.totalorder %s774_s5, %s767_s28 }
  0x41   : > { %p771_p12 = pneg %p770_p10 }
  0x42   : > { %p777_p13 = por %p776_p2, %p775_p0 }
  0x44   : > { %p778_p4 = pnand %p777_p13, %p771_p12 }
  0x46   : > { %781 = shalt.err (!%p778_p4)
}
  0x47   : > { %622 = dma.hbm_to_vmem [thread:$0]  (!%p1099_p8), %s193_s3, 128, %s196_s4, %s181_s12  }
  0x48   : > { %s202_s6 = sand.u32 1, %s938_s22   ;;  %s206_s8 = scalar_lea.vmem [#allocation6], %s533_s20 }
  0x49   : > { %s217_s9 = sshll.u32 %s206_s8, 4  ;;  %s203_s25 = scalar_lea.sflag [#allocation7], %s202_s6  ;;  %s218_s9 = int_to_ptr.vmem [resolvable:$true] %s217_s9 }
  0x4a   : > { %s795_s2 = scalar_lea.vmem %s218_s9, 128  ;;  %s944_s28 = smov [#allocation6]  }
  0x4b   : > { %p796_p5 = scmp.ne.s32.totalorder %s218_s9, %s795_s2  ;;  %s800_s19 = sshll.u32 %s944_s28, 4  ;;  %s801_s19 = int_to_ptr.vmem [resolvable:$false] %s800_s19 }
  0x4c   : > { %s802_s24 = scalar_lea.vmem %s801_s19, 256  ;;  %p803_p10 = scmp.lt.s32.totalorder %s218_s9, %s801_s19 }
  0x4d   : > { %p798_p6 = pnand %p796_p5, %p756_p9  ;;  %p804_p12 = scmp.lt.s32.totalorder %s802_s24, %s795_s2 }
  0x4f   : > { %p799_p7 = pneg %p798_p6  ;;  %p805_p0 = por %p804_p12, %p803_p10 }
  0x51   : > { %p806_p2 = pnand %p805_p0, %p799_p7 }
  0x53   : > { %809 = shalt.err (!%p806_p2)
}
  0x54   : > { %625 = dma.hbm_to_vmem [thread:$0]  (!%p1099_p8), %s1106_s30, 128, %s218_s9, %s203_s25  }
  0x55   : > { %226 = sbr.rel (%p1050_p11) target bundleno = 371 (0x173), region = 32  ;;  %s228_s3 = sand.u32 (!%p1050_p11), 1, %s914_s16  }
  0x56   : > { %s1125_s20 = sshll.u32 (!%p1050_p11), %s228_s3, 3  ;;  %s229_s4 = scalar_lea.sflag (!%p1050_p11), [#allocation4], %s228_s3 }
  0x57   : > { %s232_s12 = scalar_lea.vmem (!%p1050_p11), [#allocation3], %s1125_s20 }
  0x5a   : > { %881 = dma.done.wait (%p1033_p3), %s229_s4, 128  }
  0x5b   : > { %883 = vsyncadd (%p1033_p3), %s229_s4, 4294967168  ;;  %s237_s7 = sand.u32 1, %s1023_s23   ;;  %s241_s29 = scalar_lea.vmem [#allocation6], %s1125_s20 }
  0x5c   : > { %s238_s30 = scalar_lea.sflag [#allocation7], %s237_s7 }
  0x5d   : > { %885 = dma.done.wait (%p1033_p3), %s238_s30, 128  }
  0x5e   : > { %887 = vsyncadd (%p1033_p3), %s238_s30, 4294967168 }
  0x5f   : > { %889 = dma.done.wait (%p63_p1), [#allocation7], 2048  }
  0x60   : > { %891 = vsyncadd (%p63_p1), [#allocation7], 4294965248  ;;  %s270_s5 = sand.u32 1, %s902_s13   ;;  %p544_p11 = scmp.ne.s32.totalorder %s922_s18, 0 }
  0x61   : > { %s1145_s6 = sshll.u32 %s270_s5, 3 }
  0x62   : > { %s272_s8 = scalar_lea.vmem [#allocation9], %s1145_s6  ;;  %284 = sbr.rel (%p544_p11) target bundleno = 105 (0x69), region = 48 }
  0x67   : > { %v945_v0 = vmov 0.0  }
  0x68   : > { %285 = vst [vmem:[#allocation2] sm:$0xff] %v945_v0 }
  0x69 PF: > { %v315_v1 = vld [vmem:[#allocation8 + $0x78] sm:$0xff]  ;;  %v946_v2 = vmov 0.0   ;;  %v314_v3 = vld [vmem:[#allocation8 + $0x70] sm:$0xff]  ;;  %vm947_vm0 = vmmov 0   ;;  %v313_v4 = vld [vmem:[#allocation8 + $0x68] sm:$0xff]  ;;  %s1240_s23 = sld [smem:[#allocation15_spill]]  ;;  %v290_v14 = vlaneseq }
  0x6a   : > { %570 = vmatprep.subr.mxu0 %v946_v2  ;;  %602 = vmatprep.mubr.msk.f32.mxu0 %vm947_vm0, %v946_v2  ;;  %v312_v5 = vld [vmem:[#allocation8 + $0x60] sm:$0xff]  ;;  %v311_v6 = vld [vmem:[#allocation8 + $0x58] sm:$0xff]  ;;  %v310_v7 = vld [vmem:[#allocation8 + $0x50] sm:$0xff]  ;;  %p548_p1 = scmp.ne.s32.totalorder %s922_s18, 1 }
  0x6b   : > { %571 = vmatpush3.msra.mxu0 %v315_v1  ;;  %v309_v8 = vld [vmem:[#allocation8 + $0x48] sm:$0xff]  ;;  %v308_v9 = vld [vmem:[#allocation8 + $0x40] sm:$0xff]  ;;  %v307_v10 = vld [vmem:[#allocation8 + $0x38] sm:$0xff]  ;;  %v291_v17 = vshrl.u32 %v290_v14, 7 }
  0x6c   : > { %572 = vmatprep.subr.mxu0 %v946_v2  ;;  %v306_v11 = vld [vmem:[#allocation8 + $0x30] sm:$0xff]  ;;  %v305_v12 = vld [vmem:[#allocation8 + $0x28] sm:$0xff]  ;;  %v304_v13 = vld [vmem:[#allocation8 + $0x20] sm:$0xff] }
  0x6d   : > { %573 = vmatpush3.msra.mxu0 %v314_v3  ;;  %v303_v15 = vld [vmem:[#allocation8 + $0x18] sm:$0xff]  ;;  %v302_v16 = vld [vmem:[#allocation8 + $0x10] sm:$0xff]  ;;  %v294_v18 = vld [vmem:[%s232_s12] sm:$0xff] }
  0x6e   : > { %574 = vmatprep.subr.mxu0 %v946_v2  ;;  %v295_v19 = vld [vmem:[%s241_s29] sm:$0xff]  ;;  %v301_v20 = vld [vmem:[#allocation8 + $0x8] sm:$0xff]  ;;  %v300_v22 = vld [vmem:[#allocation8] sm:$0xff] }
  0x6f   : > { %575 = vmatpush3.msra.mxu0 %v313_v4  ;;  %s545_s26 = sshll.u32 %s1240_s23, 1  ;;  %v296_v23 = vsub.f32 %v294_v18, %v295_v19  ;;  %v387_v25 = vld [vmem:[#allocation2] sm:$0xff] }
  0x70   : > { %576 = vmatprep.subr.mxu0 %v946_v2  ;;  %s287_s9 = sadd.s32 %s922_s18, %s545_s26 }
  0x71   : > { %577 = vmatpush3.msra.mxu0 %v312_v5  ;;  %s546_s25 = sshll.u32 %s287_s9, 3 }
  0x72   : > { %578 = vmatprep.subr.mxu0 %v946_v2  ;;  %s289_s2 = ssub.s32 20, %s546_s25 }
  0x73   : > { %579 = vmatpush3.msra.mxu0 %v311_v6  ;;  %v292_v21 = vstv %s289_s2 }
  0x74   : > { %580 = vmatprep.subr.mxu0 %v946_v2  ;;  %vm293_vm1 = vcmp.lt.s32.totalorder %v291_v17, %v292_v21 }
  0x75   : > { %581 = vmatpush3.msra.mxu0 %v310_v7 }
  0x76   : > { %582 = vmatprep.subr.mxu0 %v946_v2 }
  0x77   : > { %583 = vmatpush3.msra.mxu0 %v309_v8 }
  0x78   : > { %584 = vmatprep.subr.mxu0 %v946_v2 }
  0x79   : > { %585 = vmatpush3.msra.mxu0 %v308_v9 }
  0x7a   : > { %586 = vmatprep.subr.mxu0 %v946_v2 }
  0x7b   : > { %587 = vmatpush3.msra.mxu0 %v307_v10 }
  0x7c   : > { %588 = vmatprep.subr.mxu0 %v946_v2 }
  0x7d   : > { %589 = vmatpush3.msra.mxu0 %v306_v11 }
  0x7e   : > { %590 = vmatprep.subr.mxu0 %v946_v2 }
  0x7f   : > { %591 = vmatpush3.msra.mxu0 %v305_v12 }
  0x80   : > { %592 = vmatprep.subr.mxu0 %v946_v2 }
  0x81   : > { %593 = vmatpush3.msra.mxu0 %v304_v13 }
  0x82   : > { %594 = vmatprep.subr.mxu0 %v946_v2 }
  0x83   : > { %595 = vmatpush3.msra.mxu0 %v303_v15 }
  0x84   : > { %596 = vmatprep.subr.mxu0 %v946_v2 }
  0x85   : > { %597 = vmatpush3.msra.mxu0 %v302_v16 }
  0x86   : > { %598 = vmatprep.subr.mxu0 %v946_v2 }
  0x87   : > { %599 = vmatpush3.msra.mxu0 %v301_v20 }
  0x88   : > { %600 = vmatprep.subr.mxu0 %v946_v2 }
  0x89   : > { %601 = vmatpush3.msra.mxu0 %v300_v22 }
  0x8a   : > { %603 = vmatmul.mubr.msk.f32.vlgmr.msra.gmra.mxu0 %vm293_vm1, %v296_v23 }
 0x14a   : > { %v382_v24 = vpop.f32.mrf.mxu0 }
 0x14b   : > { %v386_v26 = vand.u32 2147483647, %v382_v24  ;;  %394 = sbr.rel (%p548_p1) target bundleno = 344 (0x158), region = 52 }
 0x14c   : > { %v604_v27 = vpop.f32.mrf.mxu0 }
 0x14d   : > { %v389_v28 = vadd.f32 %v387_v25, %v386_v26 }
 0x14f   : > { %390 = vst [vmem:[#allocation2] sm:$0xff] %v389_v28 }
 0x156   : > { %v395_v29 = vld [vmem:[#allocation2] sm:$0xff] }
 0x157   : > { %396 = vst [vmem:[%s272_s8] sm:$0xff] %v395_v29 }
 0x158 PF: > { %s1241_s28 = sld [smem:[#allocation15_spill]]  ;;  %s411_s7 = sshll.u32 %s272_s8, 4  ;;  %s412_s7 = int_to_ptr.vmem [resolvable:$true] %s411_s7 }
 0x159   : > { %s1242_s19 = sld [smem:[#allocation17_spill]]  ;;  %s398_s18 = scalar_lea.sflag [#allocation5], %s270_s5 }
 0x15a   : > { %s1243_s4 = sld [smem:[#allocation20_spill]]  ;;  %s810_s30 = scalar_lea.vmem %s412_s7, 128 }
 0x15b   : > { %p811_p3 = scmp.ne.s32.totalorder %s412_s7, %s810_s30  ;;  %s948_s29 = smov [#allocation9]  }
 0x15c   : > { %s814_s23 = sshll.u32 %s948_s29, 4  ;;  %s815_s23 = int_to_ptr.vmem [resolvable:$false] %s814_s23 }
 0x15d   : > { %s816_s26 = scalar_lea.vmem %s815_s23, 256  ;;  %p817_p4 = scmp.lt.s32.totalorder %s412_s7, %s815_s23 }
 0x15e   : > { %s550_s24 = sshll.u32 %s1241_s28, 7  ;;  %p818_p5 = scmp.lt.s32.totalorder %s816_s26, %s810_s30 }
 0x15f   : > { %p1244_p8 = scmp.ne.s32.totalorder %s1242_s19, 0 }
 0x160   : > { %s409_s12 = scalar_lea.hbm %s1243_s4, %s550_s24  ;;  %p819_p6 = por %p818_p5, %p817_p4 }
 0x161   : > { %p812_p9 = pnand %p811_p3, %p1244_p8 }
 0x163   : > { %p813_p13 = pneg %p812_p9 }
 0x165   : > { %p820_p7 = pnand %p819_p6, %p813_p13 }
 0x167   : > { %823 = shalt.err (!%p820_p7)
}
 0x168   : > { %s824_s9 = scalar_lea.hbm %s409_s12, 128  ;;  %s828_s8 = scalar_lea.hbm %s1243_s4, 256 }
 0x169   : > { %p825_p10 = scmp.ne.s32.totalorder %s409_s12, %s824_s9  ;;  %p829_p2 = scmp.lt.s32.totalorder %s409_s12, %s1243_s4 }
 0x16a   : > { %p830_p11 = scmp.lt.s32.totalorder %s828_s8, %s824_s9 }
 0x16b   : > { %p826_p12 = pnand %p825_p10, %p1244_p8 }
 0x16c   : > { %p831_p1 = por %p830_p11, %p829_p2 }
 0x16d   : > { %p827_p0 = pneg %p826_p12 }
 0x16f   : > { %p832_p3 = pnand %p831_p1, %p827_p0 }
 0x171   : > { %835 = shalt.err (!%p832_p3)
}
 0x172   : > { %613 = dma.vmem_to_hbm [thread:$0]  (%p1244_p8), %s412_s7, 128, %s409_s12, %s398_s18  }
 0x173 PF: > { %s1245_s28 = sld [smem:[#allocation14_spill]]  ;;  %p633_p9 = scmp.ge.s32.totalorder %s938_s22, 2 }
 0x174   : > { %s1246_s24 = sld [smem:[#allocation18_spill]] }
 0x179   : > { %s423_s3 = sand.u32 1, %s1245_s28  }
 0x17a   : > { %p1247_p13 = scmp.ne.s32.totalorder %s1246_s24, 0  ;;  %s424_s20 = scalar_lea.sflag [#allocation5], %s423_s3 }
 0x17c   : > { %p627_p4 = pnand %p633_p9, %p1247_p13 }
 0x17e   : > { %p628_p5 = pneg %p627_p4 }
 0x180   : > { %893 = dma.done.wait (%p628_p5), %s424_s20, 128  }
 0x181   : > { %895 = vsyncadd (%p628_p5), %s424_s20, 4294967168  ;;  %s22_s22 = sadd.s32 1, %s938_s22   ;;  %s1248_s18 = sld [smem:[#allocation16_spill]] }
 0x182   : > { %p19_p6 = scmp.ge.s32.totalorder %s22_s22, 6   ;;  %s1249_s12 = smov %s902_s13 }
 0x183   : > { %s1250_s13 = smov %s906_s14  ;;  %s1251_s14 = smov %s1087_s15 }
 0x184   : > { %s1252_s15 = smov %s914_s16  ;;  %s1253_s16 = smov %s918_s17 }
 0x185   : > { %s1254_s17 = smov %s1093_s27  ;;  %s1255_s19 = smov %s934_s21 }
 0x186   : > { %s1256_s20 = smov %s1259_s10  ;;  %s1257_s21 = smov %s1263_s11 }
 0x187   :  { %21 = sbr.rel (!%p19_p6) target bundleno = 14 (0xe), region = 102 }
 0x18c   :  { %429 = vsyncpa [#allocation4], 1 }
 0x18d   :  { %431 = vsyncpa [#allocation4 + $0x1], 1 }
 0x18e   :  { %432 = vsyncpa [#allocation7], 1 }
 0x18f   :  { %434 = vsyncpa [#allocation7 + $0x1], 1 }
 0x190   :  { %435 = vsyncpa [#allocation5], 1 }
 0x191   :  { %437 = vsyncpa [#allocation5 + $0x1], 1 }

</bundles_post_ra>
